<compile_context>
chip_gen: v5e
topology: v5e:2x2
jax: 0.10.0
libtpu: 0.0.40
codegen_flags: <defaults>
</compile_context>

<pallas_src>
import functools

import numpy as np
import jax
import jax.numpy as jnp
from jax.experimental import pallas as pl
from jax.experimental.pallas import tpu as pltpu

LANE = 128     # TPU vreg lane width
SUBLANE = 8    # TPU vreg sublane count


def _round_up(x, m):
    return (x + m - 1) // m * m


def _upper_rows_kernel(shifts_ref, c_ref, u_ref, *, N, TR, add_diag):
    """Build TR rows of the strict-upper-triangular dense matrix.

    shifts_ref : (N_pad,)      int32 SMEM  - per-row lane-roll amounts (scalar prefetch)
    c_ref      : (1, 1, C_pad) f32  VMEM   - zero-padded compressed vector (resident)
    u_ref      : (1, TR, W)    f32  VMEM   - output row block (W = N_pad, lane dense)
    """
    rb = pl.program_id(1)
    i0 = rb * TR
    W = u_ref.shape[-1]
    cvec = c_ref[0]                              # (1, C_pad), loaded once per block

    rows = []
    for r in range(TR):                          # static unroll over the sublane block
        shift = shifts_ref[i0 + r]               # scalar unit / SMEM read
        rolled = pltpu.roll(cvec, shift, 1)      # XLU dynamic lane rotation
        rows.append(rolled[:, :W])               # row i's window now at lanes [0, W)
    tile = jnp.concatenate(rows, axis=0)         # (TR, W)

    row_ids = i0 + jax.lax.broadcasted_iota(jnp.int32, (TR, W), 0)
    col_ids = jax.lax.broadcasted_iota(jnp.int32, (TR, W), 1)
    keep = (col_ids > row_ids) & (col_ids < N) & (row_ids < N)
    tile = jnp.where(keep, tile, jnp.float32(0.0))
    if add_diag:
        tile = tile + jnp.where((row_ids == col_ids) & (row_ids < N),
                                jnp.float32(1.0), jnp.float32(0.0))
    u_ref[...] = tile[None]


def _symmetrize_kernel(u_ref, ut_ref, out_ref, *, N, TT, add_diag):
    """out tile (bi, bj) = U(bi, bj) + U(bj, bi)^T  (+ I where requested)."""
    bi = pl.program_id(1)
    bj = pl.program_id(2)
    a = u_ref[0]                                 # (TT, TT) tile at (bi, bj)
    b = ut_ref[0]                                # (TT, TT) tile at (bj, bi)
    out = a + b.T                                # XLU transpose (free vs. VPU)
    if add_diag:
        r = bi * TT + jax.lax.broadcasted_iota(jnp.int32, (TT, TT), 0)
        c = bj * TT + jax.lax.broadcasted_iota(jnp.int32, (TT, TT), 1)
        out = out + jnp.where((r == c) & (r < N), jnp.float32(1.0), jnp.float32(0.0))
    out_ref[...] = out[None]


def uncompress_transform(compressed_matrix, N, make_symmetric=False, ones_diagonal=False):
    """JAX wrapper mirroring UncompressTransformLayer.forward.

    compressed_matrix: (M,) or batched (B, M) with M = N*(N-1)//2.
    Returns (N, N) or (B, N, N) float32.
    """
    M = N * (N - 1) // 2
    squeeze = compressed_matrix.ndim == 1
    x = compressed_matrix[None] if squeeze else compressed_matrix
    B = x.shape[0]
    assert x.shape == (B, M), (x.shape, (B, M))
    x = x.astype(jnp.float32)

    TR = SUBLANE                                  # rows per grid step (one sublane tile)
    N_pad = _round_up(max(N, LANE), LANE)         # square, lane/sublane-dense padded size
    n_rb = N_pad // TR
    LEAD = LANE                                   # leading zero pad of the compressed vector

    # Row i of the strict upper triangle is the contiguous slice
    #   c[off_i : off_i + (N-1-i)],   off_i = i*(2N - i - 1)//2,
    # placed at columns i+1..N-1.  With c_ext[LEAD + k] = c[k], row i's window
    # starts at start_i = LEAD + off_i - (i+1), so c_ext[start_i + j] = dense[i, j]
    # for i < j < N.  The kernel rolls c_ext left by start_i (jnp.roll semantics:
    # shift = C_pad - start_i) and masks lanes outside (i, N).
    i_arr = np.arange(N, dtype=np.int64)
    offs = i_arr * (2 * N - i_arr - 1) // 2
    starts = np.full((N_pad,), LEAD, dtype=np.int64)      # padded rows: harmless value
    if N > 0:
        starts[:N] = LEAD + offs - (i_arr + 1)
    C_pad = int(_round_up(int(starts.max()) + N_pad, LANE))
    shifts = jnp.asarray((C_pad - starts) % C_pad, dtype=jnp.int32)   # (N_pad,)

    c_ext = jnp.zeros((B, 1, C_pad), jnp.float32)
    c_ext = c_ext.at[:, 0, LEAD:LEAD + M].set(x)

    add_diag_upper = bool(ones_diagonal) and not bool(make_symmetric)
    upper_kernel = functools.partial(_upper_rows_kernel, N=N, TR=TR,
                                     add_diag=add_diag_upper)

    u = pl.pallas_call(
        upper_kernel,
        out_shape=jax.ShapeDtypeStruct((B, N_pad, N_pad), jnp.float32),
        grid_spec=pltpu.PrefetchScalarGridSpec(
            num_scalar_prefetch=1,
            grid=(B, n_rb),
            in_specs=[pl.BlockSpec((1, 1, C_pad), lambda b, rb, _s: (b, 0, 0))],
            out_specs=pl.BlockSpec((1, TR, N_pad), lambda b, rb, _s: (b, rb, 0)),
        ),
        compiler_params=pltpu.CompilerParams(
            dimension_semantics=("parallel", "parallel"),
            vmem_limit_bytes=64 * 1024 * 1024,
        ),
    )(shifts, c_ext)

    if make_symmetric:
        TT = LANE
        n_t = N_pad // TT
        sym_kernel = functools.partial(_symmetrize_kernel, N=N, TT=TT,
                                       add_diag=bool(ones_diagonal))
        out_pad = pl.pallas_call(
            sym_kernel,
            out_shape=jax.ShapeDtypeStruct((B, N_pad, N_pad), jnp.float32),
            grid=(B, n_t, n_t),
            in_specs=[pl.BlockSpec((1, TT, TT), lambda b, i, j: (b, i, j)),
                      pl.BlockSpec((1, TT, TT), lambda b, i, j: (b, j, i))],
            out_specs=pl.BlockSpec((1, TT, TT), lambda b, i, j: (b, i, j)),
            compiler_params=pltpu.CompilerParams(
                dimension_semantics=("parallel", "parallel", "parallel"),
                vmem_limit_bytes=64 * 1024 * 1024,
            ),
        )(u, u)
    else:
        out_pad = u

    out = out_pad[:, :N, :N]                      # crop padded square slab
    return out[0] if squeeze else out


def _reference(compressed, N, make_symmetric=False, ones_diagonal=False):
    """Pure-JAX reference reproducing the PyTorch sparse_coo_tensor scatter."""
    rows, cols = jnp.triu_indices(N, k=1)         # same row-major order as torch
    out = jnp.zeros((N, N), jnp.float32).at[rows, cols].set(compressed)
    if make_symmetric:
        out = out.at[cols, rows].set(compressed)
    if ones_diagonal:
        out = out + jnp.eye(N, dtype=jnp.float32)
    return out


if __name__ == "__main__":
    N = 16
    M = N * (N - 1) // 2                          # 120
    key = jax.random.PRNGKey(0)
    compressed = jax.random.normal(key, (M,), dtype=jnp.float32)

    ok = True
    for make_symmetric in (False, True):
        for ones_diagonal in (False, True):
            out = jax.block_until_ready(
                uncompress_transform(compressed, N, make_symmetric, ones_diagonal))
            ref = _reference(compressed, N, make_symmetric, ones_diagonal)
            ok &= bool(jnp.allclose(out, ref, atol=1e-6, rtol=1e-6))

    # Batched call: many small matrices per launch to amortize call overhead.
    batch = jax.random.normal(jax.random.PRNGKey(1), (3, M), dtype=jnp.float32)
    out_b = jax.block_until_ready(
        uncompress_transform(batch, N, make_symmetric=True, ones_diagonal=True))
    ref_b = jnp.stack([_reference(batch[i], N, True, True) for i in range(3)])
    ok &= bool(jnp.allclose(out_b, ref_b, atol=1e-6, rtol=1e-6))

    print("KERNEL_OK" if ok else "KERNEL_MISMATCH")
</pallas_src>

<mosaic_0001>
module attributes {stable_mosaic.version = 11 : i64} {
  func.func @_upper_rows_kernel(%arg0: i32, %arg1: i32, %arg2: memref<128xi32, #tpu.memory_space<smem>>, %arg3: memref<1x1x384xf32, #tpu.memory_space<vmem>>, %arg4: memref<1x8x128xf32, #tpu.memory_space<vmem>>) attributes {dimension_semantics = [#tpu.dimension_semantics<parallel>, #tpu.dimension_semantics<parallel>], iteration_bounds = array<i64: 1, 16>, scalar_prefetch = 1 : i64, scratch_operands = 0 : i64, tpu.core_type = #tpu.core_type<tc>, window_params = [{transform_indices = @transform_0, window_bounds = array<i64: 1, 1, 384>}, {transform_indices = @transform_1, window_bounds = array<i64: 1, 8, 128>}]} {
    %c8_i32 = arith.constant 8 : i32
    %0 = arith.muli %arg1, %c8_i32 : i32
    %c0 = arith.constant 0 : index
    %c0_0 = arith.constant 0 : index
    %c0_1 = arith.constant 0 : index
    %1 = vector.load %arg3[%c0, %c0_0, %c0_1] : memref<1x1x384xf32, #tpu.memory_space<vmem>>, vector<1x1x384xf32>
    %2 = vector.shape_cast %1 : vector<1x1x384xf32> to vector<1x384xf32>
    %c0_i32 = arith.constant 0 : i32
    %3 = arith.addi %0, %c0_i32 : i32
    %4 = arith.index_cast %3 : i32 to index
    %5 = memref.load %arg2[%4] : memref<128xi32, #tpu.memory_space<smem>>
    %6 = tpu.dynamic_rotate %2 by %5 dim 1 : vector<1x384xf32>, i32 -> vector<1x384xf32>
    %7 = vector.extract_strided_slice %6 {offsets = [0, 0], sizes = [1, 128], strides = [1, 1]} : vector<1x384xf32> to vector<1x128xf32>
    %c1_i32 = arith.constant 1 : i32
    %8 = arith.addi %0, %c1_i32 : i32
    %9 = arith.index_cast %8 : i32 to index
    %10 = memref.load %arg2[%9] : memref<128xi32, #tpu.memory_space<smem>>
    %11 = tpu.dynamic_rotate %2 by %10 dim 1 : vector<1x384xf32>, i32 -> vector<1x384xf32>
    %12 = vector.extract_strided_slice %11 {offsets = [0, 0], sizes = [1, 128], strides = [1, 1]} : vector<1x384xf32> to vector<1x128xf32>
    %c2_i32 = arith.constant 2 : i32
    %13 = arith.addi %0, %c2_i32 : i32
    %14 = arith.index_cast %13 : i32 to index
    %15 = memref.load %arg2[%14] : memref<128xi32, #tpu.memory_space<smem>>
    %16 = tpu.dynamic_rotate %2 by %15 dim 1 : vector<1x384xf32>, i32 -> vector<1x384xf32>
    %17 = vector.extract_strided_slice %16 {offsets = [0, 0], sizes = [1, 128], strides = [1, 1]} : vector<1x384xf32> to vector<1x128xf32>
    %c3_i32 = arith.constant 3 : i32
    %18 = arith.addi %0, %c3_i32 : i32
    %19 = arith.index_cast %18 : i32 to index
    %20 = memref.load %arg2[%19] : memref<128xi32, #tpu.memory_space<smem>>
    %21 = tpu.dynamic_rotate %2 by %20 dim 1 : vector<1x384xf32>, i32 -> vector<1x384xf32>
    %22 = vector.extract_strided_slice %21 {offsets = [0, 0], sizes = [1, 128], strides = [1, 1]} : vector<1x384xf32> to vector<1x128xf32>
    %c4_i32 = arith.constant 4 : i32
    %23 = arith.addi %0, %c4_i32 : i32
    %24 = arith.index_cast %23 : i32 to index
    %25 = memref.load %arg2[%24] : memref<128xi32, #tpu.memory_space<smem>>
    %26 = tpu.dynamic_rotate %2 by %25 dim 1 : vector<1x384xf32>, i32 -> vector<1x384xf32>
    %27 = vector.extract_strided_slice %26 {offsets = [0, 0], sizes = [1, 128], strides = [1, 1]} : vector<1x384xf32> to vector<1x128xf32>
    %c5_i32 = arith.constant 5 : i32
    %28 = arith.addi %0, %c5_i32 : i32
    %29 = arith.index_cast %28 : i32 to index
    %30 = memref.load %arg2[%29] : memref<128xi32, #tpu.memory_space<smem>>
    %31 = tpu.dynamic_rotate %2 by %30 dim 1 : vector<1x384xf32>, i32 -> vector<1x384xf32>
    %32 = vector.extract_strided_slice %31 {offsets = [0, 0], sizes = [1, 128], strides = [1, 1]} : vector<1x384xf32> to vector<1x128xf32>
    %c6_i32 = arith.constant 6 : i32
    %33 = arith.addi %0, %c6_i32 : i32
    %34 = arith.index_cast %33 : i32 to index
    %35 = memref.load %arg2[%34] : memref<128xi32, #tpu.memory_space<smem>>
    %36 = tpu.dynamic_rotate %2 by %35 dim 1 : vector<1x384xf32>, i32 -> vector<1x384xf32>
    %37 = vector.extract_strided_slice %36 {offsets = [0, 0], sizes = [1, 128], strides = [1, 1]} : vector<1x384xf32> to vector<1x128xf32>
    %c7_i32 = arith.constant 7 : i32
    %38 = arith.addi %0, %c7_i32 : i32
    %39 = arith.index_cast %38 : i32 to index
    %40 = memref.load %arg2[%39] : memref<128xi32, #tpu.memory_space<smem>>
    %41 = tpu.dynamic_rotate %2 by %40 dim 1 : vector<1x384xf32>, i32 -> vector<1x384xf32>
    %42 = vector.extract_strided_slice %41 {offsets = [0, 0], sizes = [1, 128], strides = [1, 1]} : vector<1x384xf32> to vector<1x128xf32>
    %43 = tpu.concatenate %7, %12, %17, %22, %27, %32, %37, %42 in 0 : vector<1x128xf32>, vector<1x128xf32>, vector<1x128xf32>, vector<1x128xf32>, vector<1x128xf32>, vector<1x128xf32>, vector<1x128xf32>, vector<1x128xf32> -> vector<8x128xf32>
    %44 = tpu.iota {dimensions = array<i32: 0>} : vector<8x128xi32>
    %45 = vector.broadcast %0 : i32 to vector<8x128xi32>
    %46 = arith.addi %45, %44 : vector<8x128xi32>
    %47 = tpu.iota {dimensions = array<i32: 1>} : vector<8x128xi32>
    %48 = arith.cmpi sgt, %47, %46 : vector<8x128xi32>
    %c16_i32 = arith.constant 16 : i32
    %49 = vector.broadcast %c16_i32 : i32 to vector<8x128xi32>
    %50 = arith.cmpi slt, %47, %49 : vector<8x128xi32>
    %51 = arith.andi %48, %50 : vector<8x128xi1>
    %c16_i32_2 = arith.constant 16 : i32
    %52 = vector.broadcast %c16_i32_2 : i32 to vector<8x128xi32>
    %53 = arith.cmpi slt, %46, %52 : vector<8x128xi32>
    %54 = arith.andi %51, %53 : vector<8x128xi1>
    %cst = arith.constant 0.000000e+00 : f32
    %55 = vector.broadcast %cst : f32 to vector<8x128xf32>
    %56 = arith.select %54, %43, %55 : vector<8x128xi1>, vector<8x128xf32>
    %57 = vector.shape_cast %56 : vector<8x128xf32> to vector<1x8x128xf32>
    %c0_3 = arith.constant 0 : index
    %c0_4 = arith.constant 0 : index
    %c0_5 = arith.constant 0 : index
    %58 = vector.load %arg4[%c0_3, %c0_4, %c0_5] : memref<1x8x128xf32, #tpu.memory_space<vmem>>, vector<1x8x128xf32>
    tpu.vector_store %arg4[%c0_3, %c0_4, %c0_5], %57 {strides = array<i32>} : memref<1x8x128xf32, #tpu.memory_space<vmem>>, vector<1x8x128xf32>,
    return
  }
  func.func @transform_0(%arg0: i32, %arg1: i32, %arg2: memref<128xi32, #tpu.memory_space<smem>>) -> (i32, i32, i32) {
    %c0_i32 = arith.constant 0 : i32
    %c0_i32_0 = arith.constant 0 : i32
    %c0_i32_1 = arith.constant 0 : i32
    return %arg0, %c0_i32, %c0_i32_0 : i32, i32, i32
  }
  func.func @transform_1(%arg0: i32, %arg1: i32, %arg2: memref<128xi32, #tpu.memory_space<smem>>) -> (i32, i32, i32) {
    %c0_i32 = arith.constant 0 : i32
    %c0_i32_0 = arith.constant 0 : i32
    return %arg0, %arg1, %c0_i32 : i32, i32, i32
  }
}

</mosaic_0001>

<bundles_post_ra>
// kernel: tpu_custom_call.1
= control target key start
LH: loop header
LB: loop body
LE: loop exit
PB: predicated region body
PF: predicated region fallthrough
CT: control target
= control target key end

     0   :  { %s725_s12 = smov [#allocation3]   ;;  %s985_s0 = inlined_call_operand.hbm [shape: s32[128], index: 0, kind: input, shape index: {}]   ;;  %s986_s1 = inlined_call_operand.hbm [shape: f32[1,1,384], index: 1, kind: input, shape index: {}]   ;;  %s987_s2 = inlined_call_operand.hbm [shape: f32[1,128,128], index: 2, kind: output, shape index: {}]  }
   0x1   :  { %990 = sst [smem:[#allocation13_spill]] %s986_s1  ;;  %s8_s11 = sshll.u32 %s985_s0, 4  ;;  %s9_s11 = int_to_ptr.hbm [resolvable:$true] %s8_s11 }
   0x2   :  { %11 = dma.hbm_to_smem %s9_s11, 16, %s725_s12, [#allocation2] }
   0x3   :  { %691 = dma.done.wait [#allocation2], 16 }
   0x4   :  { %692 = vsyncadd [#allocation2], 4294967280 }
   0x5   :  { %14 = sfence }
   0x6   :  { %15 = vsyncpa [#allocation5], 0 }
   0x7   :  { %16 = vsyncpa [#allocation6], 0 }
   0x8   :  { %18 = vsyncpa [#allocation6 + $0x1], 0  ;;  %s745_s13 = smov 0   ;;  %s747_s14 = smov 0  }
   0x9   :  { %s749_s15 = smov 0   ;;  %s751_s16 = smov 0  }
   0xa   :  { %s753_s17 = smov 0   ;;  %s755_s0 = smov 0  }
   0xb LB: > { %991 = sst [smem:[#allocation11_spill]] %s719_s17  ;;  %s493_s18 = sadd.s32 4294967295, %s723_s0   ;;  %s723_s0 = sphi %s755_s0, %s24_s0   ;;  %s719_s17 = sphi %s753_s17, %s1005_s17   ;;  %s715_s16 = sphi %s751_s16, %s1004_s16   ;;  %s711_s15 = sphi %s749_s15, %s1008_s15   ;;  %s707_s14 = sphi %s747_s14, %s1007_s14   ;;  %s703_s13 = sphi %s745_s13, %s1006_s13  }
   0xc   : > { %s494_s19 = sadd.s32 4294967294, %s723_s0   ;;  %s33_s20 = sadd.s32 1, %s719_s17 }
   0xd   : > { %s71_s21 = sadd.s32 1, %s711_s15  ;;  %p34_p0 = scmp.ge.s32.totalorder %s33_s20, 16 }
   0xe   : > { %p81_p1 = scmp.ne.s32.totalorder %s711_s15, %s707_s14  ;;  %p82_p2 = scmp.eq.s32.totalorder %s493_s18, 15 }
   0xf   : > { %p87_p3 = scmp.ne.s32.totalorder %s707_s14, %s703_s13  ;;  %s1010_s20 = smov (%p34_p0, %s33_s20), 0 }
  0x10   : > { %992 = sst [smem:[#allocation12_spill]] %s1010_s20  ;;  %p785_p4 = por %p82_p2, %p81_p1 }
  0x11   : > { %p88_p5 = scmp.eq.s32.totalorder %s494_s19, 15  ;;  %s67_s23 = ssub.s32 %s719_s17, %s1010_s20 }
  0x12   : > { %p495_p6 = scmp.ge.s32.totalorder %s723_s0, 1  ;;  %p69_p7 = scmp.eq.s32.totalorder %s67_s23, 0 }
  0x13   : > { %p792_p8 = por %p88_p5, %p87_p3  ;;  %p95_p9 = scmp.lt.s32.totalorder %s723_s0, 17 }
  0x14   : > { %s798_s25 = scalar_select %p69_p7, %s711_s15, %s71_s21  }
  0x15   : > { %p96_p10 = pnand %p495_p6, %p95_p9  ;;  %p519_p11 = scmp.eq.s32.totalorder %s493_s18, 0 }
  0x16   : > { %s995_s1 = sld [smem:[#allocation13_spill]]  ;;  %s726_s29 = smov [#allocation4]  }
  0x17   : > { %p511_p12 = pneg %p96_p10  ;;  %s111_s30 = sshll.u32 %s726_s29, 4  ;;  %s112_s30 = int_to_ptr.vmem [resolvable:$true] %s111_s30 }
  0x19   : > { %p512_p13 = pnand %p519_p11, %p511_p12  ;;  %124 = sbr.rel (%p96_p10) target bundleno = 231 (0xe7), region = 24 }
  0x1c   : > { %s109_s28 = sshll.u32 %s995_s1, 4  ;;  %s110_s28 = int_to_ptr.hbm [resolvable:$true] %s109_s28 }
  0x1d   : > { %514 = dma.hbm_to_vmem [thread:$0]  (!%p512_p13), %s110_s28, 48, %s112_s30, [#allocation5]  }
  0x1e   : > { %694 = dma.done.wait (%p519_p11), [#allocation5], 48  }
  0x1f   : > { %696 = vsyncadd (%p519_p11), [#allocation5], 4294967248  ;;  %s804_s3 = sshll.u32 %s715_s16, 3  ;;  %v141_v0 = vld [vmem:[#allocation4] sm:$0x7]  ;;  %v161_v6 = vlaneseq  ;;  %vm379_vm6 = vcmask 1040384  }
  0x20   : > { %s142_s4 = sld [smem:[#allocation3 + %s804_s3]]  ;;  %s176_s5 = sadd.s32 1, %s804_s3  ;;  %v146_v1 = vperm.slane %v141_v0, 2  ;;  %v144_v2 = vperm.slane %v141_v0, 0  ;;  %v145_v3 = vperm.slane %v141_v0, 1  ;;  %vm381_vm10 = vcmask 1041408  }
  0x21   : > { %s177_s6 = sld [smem:[#allocation3 + %s176_s5]]  ;;  %s202_s7 = sadd.s32 2, %s804_s3  ;;  %v881_v9 = vand.u32 127, %v161_v6  ;;  %vm383_vm14 = vcmask 1042432  }
  0x22   : > { %s203_s8 = sld [smem:[#allocation3 + %s202_s7]]  ;;  %s228_s9 = sadd.s32 3, %s804_s3 }
  0x23   : > { %s229_s10 = sld [smem:[#allocation3 + %s228_s9]]  ;;  %s254_s11 = sadd.s32 4, %s804_s3 }
  0x24   : > { %s255_s12 = sld [smem:[#allocation3 + %s254_s11]]  ;;  %s280_s18 = sadd.s32 5, %s804_s3 }
  0x25   : > { %s281_s16 = sld [smem:[#allocation3 + %s280_s18]]  ;;  %s306_s19 = sadd.s32 6, %s804_s3 }
  0x26   : > { %573 = sdivrem.u32 %s142_s4, 384  ;;  %s307_s21 = sld [smem:[#allocation3 + %s306_s19]] }
  0x27   : > { %576 = sdivrem.u32 %s177_s6, 384  ;;  %s332_s23 = sadd.s32 7, %s804_s3 }
  0x28   : > { %579 = sdivrem.u32 %s203_s8, 384  ;;  %s333_s26 = sld [smem:[#allocation3 + %s332_s23]] }
  0x29   : > { %582 = sdivrem.u32 %s229_s10, 384 }
  0x2a   : > { %585 = sdivrem.u32 %s255_s12, 384 }
  0x2b   : > { %588 = sdivrem.u32 %s281_s16, 384 }
  0x2c   : > { %591 = sdivrem.u32 %s307_s21, 384 }
  0x2f   : > { %s574_s27 = spop.drf %573  ;;  %594 = sdivrem.u32 %s333_s26, 384 }
  0x30   : > { %s814_s28 = spop.drf %573 }
  0x31   : > { %s817_s29 = sand.u32 127, %s814_s28   ;;  %s577_s30 = spop.drf %576 }
  0x32   : > { %158 = vrot.lane.b32.xlu1 %v146_v1, %s817_s29  ;;  %154 = vrot.lane.b32.xlu0 %v144_v2, %s817_s29  ;;  %s821_s4 = spop.drf %576  ;;  %v160_v11 = vstv %s817_s29 }
  0x33   : > { %s824_s5 = sand.u32 127, %s821_s4   ;;  %s580_s6 = spop.drf %579  ;;  %vm891_vm1 = vcmp.lt.s32.totalorder %v881_v9, %v160_v11 }
  0x34   : > { %184 = vrot.lane.b32.xlu2 %v145_v3, %s824_s5  ;;  %s827_s7 = spop.drf %579  ;;  %v188_v10 = vstv %s824_s5 }
  0x35   : > { %s583_s8 = spop.drf %582  ;;  %s841_s23 = sand.u32 127, %s827_s7   ;;  %vm886_vm0 = vcmp.lt.s32.totalorder %v881_v9, %v188_v10 }
  0x36   : > { %s829_s9 = spop.drf %582  ;;  %v214_v36 = vstv %s841_s23 }
  0x37   : > { %s586_s10 = spop.drf %585  ;;  %s847_s26 = sand.u32 127, %s829_s9   ;;  %vm215_vm7 = vcmp.lt.s32.totalorder %v881_v9, %v214_v36 }
  0x38   : > { %s831_s11 = spop.drf %585  ;;  %v240_v50 = vstv %s847_s26 }
  0x39   : > { %s589_s12 = spop.drf %588  ;;  %s853_s27 = sand.u32 127, %s831_s11   ;;  %vm241_vm11 = vcmp.lt.s32.totalorder %v881_v9, %v240_v50 }
  0x3a   : > { %182 = vrot.lane.b32.xlu1 %v144_v2, %s824_s5  ;;  %156 = vrot.lane.b32.xlu0 %v145_v3, %s817_s29  ;;  %s835_s18 = spop.drf %588  ;;  %s181_s12 = sshrl.u32 %s821_s4, 7  ;;  %v266_v0 = vstv %s853_s27 }
  0x3b   : > { %s592_s16 = spop.drf %591  ;;  %s859_s30 = sand.u32 127, %s835_s18   ;;  %vm267_vm15 = vcmp.lt.s32.totalorder %v881_v9, %v266_v0 }
  0x3c   : > { %186 = vrot.lane.b32.xlu2 %v146_v1, %s824_s5  ;;  %s838_s19 = spop.drf %591  ;;  %s153_s16 = sshrl.u32 %s814_s28, 7 }
  0x3d   : > { %s595_s21 = spop.drf %594  ;;  %s865_s6 = sand.u32 127, %s838_s19  }
  0x3e   : > { %s869_s8 = spop.drf %594  ;;  %s193_s21 = sand.u32 1, %s181_s12 }
  0x3f   : > { %s873_s10 = sand.u32 127, %s869_s8   ;;  %s198_s1 = sand.u32 2, %s181_s12  ;;  %v194_v12 = vstv %s193_s21 }
  0x40   : > { %s167_s20 = sand.u32 1, %s153_s16  ;;  %s172_s17 = sand.u32 2, %s153_s16  ;;  %v199_v13 = vstv %s198_s1  ;;  %vm195_vm2 = vcmp.ne.s32.totalorder %v194_v12, 0 }
  0x41   : > { %v168_v14 = vstv %s167_s20  ;;  %v173_v15 = vstv %s172_s17  ;;  %vm895_vm3 = vcmp.ne.s32.totalorder %v199_v13, 0  ;;  %s207_s1 = sshrl.u32 %s827_s7, 7  ;;  %s233_s28 = sshrl.u32 %s829_s9, 7 }
  0x42   : > { %210 = vrot.lane.b32.xlu1 %v145_v3, %s841_s23  ;;  %208 = vrot.lane.b32.xlu0 %v144_v2, %s841_s23  ;;  %vm169_vm4 = vcmp.ne.s32.totalorder %v168_v14, 0  ;;  %vm903_vm5 = vcmp.ne.s32.totalorder %v173_v15, 0  ;;  %s219_s17 = sand.u32 1, %s207_s1  ;;  %s224_s20 = sand.u32 2, %s207_s1 }
  0x43   : > { %v220_v38 = vstv %s219_s17  ;;  %v225_v39 = vstv %s224_s20  ;;  %s245_s29 = sand.u32 1, %s233_s28  ;;  %s250_s4 = sand.u32 2, %s233_s28 }
  0x44   : > { %212 = vrot.lane.b32.xlu2 %v146_v1, %s841_s23  ;;  %vm221_vm8 = vcmp.ne.s32.totalorder %v220_v38, 0  ;;  %vm226_vm9 = vcmp.ne.s32.totalorder %v225_v39, 0  ;;  %v246_v52 = vstv %s245_s29  ;;  %v251_v53 = vstv %s250_s4  ;;  %s259_s5 = sshrl.u32 %s831_s11, 7  ;;  %s285_s11 = sshrl.u32 %s835_s18, 7 }
  0x45   : > { %vm247_vm12 = vcmp.ne.s32.totalorder %v246_v52, 0  ;;  %vm252_vm13 = vcmp.ne.s32.totalorder %v251_v53, 0  ;;  %s271_s7 = sand.u32 1, %s259_s5  ;;  %s276_s9 = sand.u32 2, %s259_s5 }
  0x46   : > { %s297_s23 = sand.u32 1, %s285_s11  ;;  %s311_s18 = sshrl.u32 %s838_s19, 7 }
  0x47   : > { %v298_v18 = vstv %s297_s23  ;;  %s337_s19 = sshrl.u32 %s869_s8, 7  ;;  %s137_s12 = sand.u32 1, %s707_s14  }
  0x48   : > { %s354_s8 = sand.u32 2, %s337_s19  ;;  %s941_s16 = sshll.u32 %s137_s12, 3 }
  0x49   : > { %s139_s17 = scalar_lea.vmem [#allocation7], %s941_s16 }
  0x4a   : > { %236 = vrot.lane.b32.xlu1 %v145_v3, %s847_s26  ;;  %234 = vrot.lane.b32.xlu0 %v144_v2, %s847_s26  ;;  %s419_s20 = sshll.u32 %s139_s17, 4  ;;  %s420_s20 = int_to_ptr.vmem [resolvable:$true] %s419_s20 }
  0x4c   : > { %238 = vrot.lane.b32.xlu2 %v146_v1, %s847_s26  ;;  %s302_s26 = sand.u32 2, %s285_s11 }
  0x4d   : > { %v303_v19 = vstv %s302_s26 }
  0x52   : > { %262 = vrot.lane.b32.xlu1 %v145_v3, %s853_s27  ;;  %260 = vrot.lane.b32.xlu0 %v144_v2, %s853_s27 }
  0x54   : > { %264 = vrot.lane.b32.xlu2 %v146_v1, %s853_s27  ;;  %s323_s27 = sand.u32 1, %s311_s18 }
  0x5a   : > { %288 = vrot.lane.b32.xlu1 %v145_v3, %s859_s30  ;;  %286 = vrot.lane.b32.xlu0 %v144_v2, %s859_s30 }
  0x5c   : > { %290 = vrot.lane.b32.xlu2 %v146_v1, %s859_s30 }
  0x62   : > { %314 = vrot.lane.b32.xlu1 %v145_v3, %s865_s6  ;;  %312 = vrot.lane.b32.xlu0 %v144_v2, %s865_s6 }
  0x64   : > { %316 = vrot.lane.b32.xlu2 %v146_v1, %s865_s6 }
  0x6a   : > { %340 = vrot.lane.b32.xlu1 %v145_v3, %s873_s10  ;;  %338 = vrot.lane.b32.xlu0 %v144_v2, %s873_s10  ;;  %v272_v2 = vstv %s271_s7  ;;  %v277_v3 = vstv %s276_s9  ;;  %s659_s9 = scalar_lea.hbm %s987_s2, 128 }
  0x6c   : > { %342 = vrot.lane.b32.xlu2 %v146_v1, %s873_s10 }
  0x8e   : > { %v185_v4 = vpop.permute.xlu2 %184 }
  0x96   : > { %v187_v5 = vpop.permute.xlu2 %186 }
  0x97   : > { %v190_v20 = vsel %vm886_vm0, %v185_v4, %v187_v5 }
  0x9e   : > { %v213_v16 = vpop.permute.xlu2 %212 }
  0xa4   : > { %v159_v7 = vpop.permute.xlu1 %158  ;;  %v155_v8 = vpop.permute.xlu0 %154 }
  0xa5   : > { %v166_v21 = vsel %vm891_vm1, %v159_v7, %v155_v8 }
  0xa6   : > { %v239_v40 = vpop.permute.xlu2 %238 }
  0xac   : > { %v183_v22 = vpop.permute.xlu1 %182  ;;  %v157_v24 = vpop.permute.xlu0 %156 }
  0xad   : > { %v191_v25 = vsel %vm886_vm0, %v183_v22, %v185_v4  ;;  %v192_v26 = vsel %vm886_vm0, %v187_v5, %v183_v22  ;;  %v164_v27 = vsel %vm891_vm1, %v157_v24, %v159_v7  ;;  %v165_v28 = vsel %vm891_vm1, %v155_v8, %v157_v24 }
  0xae   : > { %v196_v29 = vsel %vm195_vm2, %v190_v20, %v192_v26  ;;  %v197_v30 = vsel %vm195_vm2, %v192_v26, %v191_v25  ;;  %v170_v31 = vsel %vm169_vm4, %v164_v27, %v166_v21  ;;  %v171_v32 = vsel %vm169_vm4, %v166_v21, %v165_v28  ;;  %v265_v59 = vpop.permute.xlu2 %264 }
  0xaf   : > { %v201_v33 = vsel %vm895_vm3, %v197_v30, %v196_v29  ;;  %v175_v34 = vsel %vm903_vm5, %v171_v32, %v170_v31  ;;  %vm273_vm0 = vcmp.ne.s32.totalorder %v272_v2, 0  ;;  %vm278_vm1 = vcmp.ne.s32.totalorder %v277_v3, 0 }
  0xb0   : > { %v359_v35 = vrot.slane %v201_v33, 7  ;;  %vm385_vm2 = vcmask 1043456   ;;  %vm299_vm4 = vcmp.ne.s32.totalorder %v298_v18, 0  ;;  %vm304_vm5 = vcmp.ne.s32.totalorder %v303_v19, 0 }
  0xb1   : > { %v318_v30 = vstv %s865_s6  ;;  %v324_v32 = vstv %s323_s27  ;;  %v394_v33 = vshrl.u32 %v161_v6, 7  ;;  %s349_s6 = sand.u32 1, %s337_s19 }
  0xb2   : > { %v380_v37 = vsel %vm379_vm6, %v175_v34, %v359_v35  ;;  %vm387_vm6 = vcmask 1044480   ;;  %v395_v35 = vstv %s804_s3 }
  0xb4   : > { %v211_v41 = vpop.permute.xlu1 %210  ;;  %v209_v42 = vpop.permute.xlu0 %208 }
  0xb5   : > { %v216_v43 = vsel %vm215_vm7, %v211_v41, %v213_v16  ;;  %v217_v44 = vsel %vm215_vm7, %v209_v42, %v211_v41  ;;  %v218_v45 = vsel %vm215_vm7, %v213_v16, %v209_v42  ;;  %v292_v16 = vstv %s859_s30  ;;  %s328_s30 = sand.u32 2, %s311_s18 }
  0xb6   : > { %v222_v46 = vsel %vm221_vm8, %v216_v43, %v218_v45  ;;  %v223_v47 = vsel %vm221_vm8, %v218_v45, %v217_v44  ;;  %v291_v14 = vpop.permute.xlu2 %290  ;;  %vm293_vm3 = vcmp.lt.s32.totalorder %v881_v9, %v292_v16  ;;  %v329_v34 = vstv %s328_s30 }
  0xb7   : > { %v227_v48 = vsel %vm226_vm9, %v223_v47, %v222_v46  ;;  %vm319_vm7 = vcmp.lt.s32.totalorder %v881_v9, %v318_v30  ;;  %vm325_vm8 = vcmp.ne.s32.totalorder %v324_v32, 0  ;;  %vm330_vm9 = vcmp.ne.s32.totalorder %v329_v34, 0 }
  0xb8   : > { %v362_v49 = vrot.slane %v227_v48, 6  ;;  %v396_v43 = vadd.s32 %v395_v35, %v394_v33  ;;  %v344_v45 = vstv %s873_s10  ;;  %v350_v46 = vstv %s349_s6  ;;  %s417_s10 = scalar_lea.hbm %s987_s2, %s804_s3  ;;  %s405_s3 = scalar_lea.sflag [#allocation6], %s137_s12 }
  0xb9   : > { %s421_s28 = sshll.u32 %s417_s10, 4  ;;  %s422_s28 = int_to_ptr.hbm [resolvable:$true] %s421_s28 }
  0xba   : > { %v382_v51 = vsel %vm381_vm10, %v380_v37, %v362_v49  ;;  %vm389_vm10 = vcmask 1045504   ;;  %v355_v49 = vstv %s354_s8  ;;  %s653_s29 = sshra.s32 %s422_s28, 4  ;;  %s654_s29 = int_to_ptr.hbm [resolvable:$true] %s653_s29 }
  0xbb   : > { %s655_s4 = scalar_lea.hbm %s654_s29, 8  ;;  %p660_p3 = scmp.lt.s32.totalorder %s654_s29, %s987_s2 }
  0xbc   : > { %v237_v54 = vpop.permute.xlu1 %236  ;;  %v235_v55 = vpop.permute.xlu0 %234  ;;  %p656_p0 = scmp.ne.s32.totalorder %s654_s29, %s655_s4  ;;  %p661_p5 = scmp.lt.s32.totalorder %s659_s9, %s655_s4 }
  0xbd   : > { %v242_v56 = vsel %vm241_vm11, %v237_v54, %v239_v40  ;;  %v243_v57 = vsel %vm241_vm11, %v235_v55, %v237_v54  ;;  %v244_v58 = vsel %vm241_vm11, %v239_v40, %v235_v55  ;;  %vm397_vm11 = vcmp.gt.s32.totalorder %v881_v9, %v396_v43 }
  0xbe   : > { %v248_v60 = vsel %vm247_vm12, %v242_v56, %v244_v58  ;;  %v249_v61 = vsel %vm247_vm12, %v244_v58, %v243_v57  ;;  %v317_v29 = vpop.permute.xlu2 %316  ;;  %vm398_vm12 = vcmp.lt.s32.totalorder %v881_v9, 16  ;;  %p657_p1 = pnand %p656_p0, %p785_p4  ;;  %p662_p6 = por %p661_p5, %p660_p3 }
  0xbf   : > { %v253_v62 = vsel %vm252_vm13, %v249_v61, %v248_v60  ;;  %vm345_vm13 = vcmp.lt.s32.totalorder %v881_v9, %v344_v45 }
  0xc0   : > { %v365_v63 = vrot.slane %v253_v62, 5  ;;  %p658_p2 = pneg %p657_p1 }
  0xc2   : > { %v384_v1 = vsel %vm383_vm14, %v382_v51, %v365_v63  ;;  %vm351_vm14 = vcmp.ne.s32.totalorder %v350_v46, 0  ;;  %p663_p7 = pnand %p662_p6, %p658_p2 }
  0xc4   : > { %v263_v4 = vpop.permute.xlu1 %262  ;;  %v261_v5 = vpop.permute.xlu0 %260 }
  0xc5   : > { %v268_v7 = vsel %vm267_vm15, %v263_v4, %v265_v59  ;;  %v269_v8 = vsel %vm267_vm15, %v261_v5, %v263_v4  ;;  %v270_v10 = vsel %vm267_vm15, %v265_v59, %v261_v5  ;;  %vm399_vm15 = vmand %vm397_vm11, %vm398_vm12 }
  0xc6   : > { %v274_v11 = vsel %vm273_vm0, %v268_v7, %v270_v10  ;;  %v275_v12 = vsel %vm273_vm0, %v270_v10, %v269_v8  ;;  %v343_v48 = vpop.permute.xlu2 %342  ;;  %vm400_vm0 = vcmp.lt.s32.totalorder %v396_v43, 16 }
  0xc7   : > { %v279_v13 = vsel %vm278_vm1, %v275_v12, %v274_v11  ;;  %vm356_vm1 = vcmp.ne.s32.totalorder %v355_v49, 0 }
  0xc8   : > { %v368_v15 = vrot.slane %v279_v13, 4 }
  0xca   : > { %v386_v17 = vsel %vm385_vm2, %v384_v1, %v368_v15  ;;  %vm391_vm2 = vcmask 1046528  }
  0xcc   : > { %v289_v20 = vpop.permute.xlu1 %288  ;;  %v287_v21 = vpop.permute.xlu0 %286 }
  0xcd   : > { %v294_v22 = vsel %vm293_vm3, %v289_v20, %v291_v14  ;;  %v295_v23 = vsel %vm293_vm3, %v287_v21, %v289_v20  ;;  %v296_v24 = vsel %vm293_vm3, %v291_v14, %v287_v21  ;;  %vm401_vm3 = vmand %vm399_vm15, %vm400_vm0 }
  0xce   : > { %v300_v25 = vsel %vm299_vm4, %v294_v22, %v296_v24  ;;  %v301_v26 = vsel %vm299_vm4, %v296_v24, %v295_v23 }
  0xcf   : > { %v305_v27 = vsel %vm304_vm5, %v301_v26, %v300_v25 }
  0xd0   : > { %v371_v28 = vrot.slane %v305_v27, 3 }
  0xd2   : > { %v388_v31 = vsel %vm387_vm6, %v386_v17, %v371_v28 }
  0xd4   : > { %v315_v36 = vpop.permute.xlu1 %314  ;;  %v313_v37 = vpop.permute.xlu0 %312 }
  0xd5   : > { %v320_v38 = vsel %vm319_vm7, %v315_v36, %v317_v29  ;;  %v321_v39 = vsel %vm319_vm7, %v313_v37, %v315_v36  ;;  %v322_v40 = vsel %vm319_vm7, %v317_v29, %v313_v37 }
  0xd6   : > { %v326_v41 = vsel %vm325_vm8, %v320_v38, %v322_v40  ;;  %v327_v42 = vsel %vm325_vm8, %v322_v40, %v321_v39 }
  0xd7   : > { %v331_v6 = vsel %vm330_vm9, %v327_v42, %v326_v41 }
  0xd8   : > { %v374_v44 = vrot.slane %v331_v6, 2 }
  0xda   : > { %v390_v47 = vsel %vm389_vm10, %v388_v31, %v374_v44 }
  0xdc   : > { %v341_v50 = vpop.permute.xlu1 %340  ;;  %v339_v51 = vpop.permute.xlu0 %338 }
  0xdd   : > { %v346_v52 = vsel %vm345_vm13, %v341_v50, %v343_v48  ;;  %v347_v53 = vsel %vm345_vm13, %v339_v51, %v341_v50  ;;  %v348_v54 = vsel %vm345_vm13, %v343_v48, %v339_v51 }
  0xde   : > { %v352_v55 = vsel %vm351_vm14, %v346_v52, %v348_v54  ;;  %v353_v56 = vsel %vm351_vm14, %v348_v54, %v347_v53 }
  0xdf   : > { %v357_v57 = vsel %vm356_vm1, %v353_v56, %v352_v55 }
  0xe0   : > { %v377_v9 = vrot.slane %v357_v57, 1 }
  0xe2   : > { %v392_v58 = vsel %vm391_vm2, %v390_v47, %v377_v9 }
  0xe3   : > { %v402_v59 = vsel %vm401_vm3, %v392_v58, 0.0 }
  0xe4   : > { %403 = vst [vmem:[%s139_s17] sm:$0xff] %v402_v59 }
  0xe5   : > { %666 = shalt.err (!%p663_p7)
}
  0xe6   : > { %509 = dma.vmem_to_hbm [thread:$0]  (%p785_p4), %s420_s20, 128, %s422_s28, %s405_s3  }
  0xe7 PF: > { %p521_p9 = scmp.ge.s32.totalorder %s723_s0, 2  ;;  %s433_s26 = sand.u32 1, %s703_s13  }
  0xe8   : > { %s434_s18 = scalar_lea.sflag [#allocation6], %s433_s26 }
  0xe9   : > { %p516_p10 = pnand %p521_p9, %p792_p8 }
  0xeb   : > { %p517_p11 = pneg %p516_p10 }
  0xed   : > { %698 = dma.done.wait (%p517_p11), %s434_s18, 128  }
  0xee   : > { %700 = vsyncadd (%p517_p11), %s434_s18, 4294967168  ;;  %s24_s0 = sadd.s32 1, %s723_s0   ;;  %s1004_s16 = sld [smem:[#allocation11_spill]] }
  0xef   : > { %p21_p12 = scmp.ge.s32.totalorder %s24_s0, 18   ;;  %s1005_s17 = sld [smem:[#allocation12_spill]] }
  0xf0   : > { %s1006_s13 = smov %s707_s14  ;;  %s1007_s14 = smov %s711_s15 }
  0xf1   : > { %s1008_s15 = smov %s798_s25  ;;  %23 = sbr.rel (!%p21_p12) target bundleno = 11 (0xb), region = 62 }
  0xf6   :  { %440 = vsyncpa [#allocation5], 1 }
  0xf7   :  { %442 = vsyncpa [#allocation5 + $0x1], 1 }
  0xf8   :  { %443 = vsyncpa [#allocation6], 1 }
  0xf9   :  { %445 = vsyncpa [#allocation6 + $0x1], 1 }

</bundles_post_ra>
